<compile_context>
chip_gen: v6e
topology: v6e:2x2x1
jax: 0.10.0
libtpu: 0.0.40
codegen_flags: <defaults>
</compile_context>

<pallas_src>
import functools
import math

import jax
import jax.numpy as jnp
from jax import lax
from jax.experimental import pallas as pl
from jax.experimental.pallas import tpu as pltpu

_LANES = 128
# v7x-safe scoped-VMEM budget (64 MiB physical there); comfortably above the
# v5e (16 MiB) / v6e (32 MiB) scoped defaults so large tiles are allowed.
_VMEM_BUDGET = 48 * 1024 * 1024


def _cosface_kernel(t_ref, cos_ref, out_ref, l_sc, *,
                    s, s_m, em, B, B_TILE, C, C_TILE, mask_rows, mask_cols):
    b = pl.program_id(0)
    c = pl.program_id(1)
    nc = pl.num_programs(1)

    # (re)initialize the running exp-sum per b-tile
    @pl.when(c == 0)
    def _init():
        l_sc[...] = jnp.zeros((B_TILE, 1), dtype=jnp.float32)

    cos = cos_ref[...].astype(jnp.float32)            # (B_TILE, C_TILE)
    # cos ∈ [-1, 1]  =>  s*cos <= s is a static max bound: no online max,
    # no per-tile cross-lane max, no rescale chain.
    p = jnp.exp(s * cos - s)
    if mask_cols:
        # mask the exp *result* so padded class columns contribute exactly 0
        # (garbage in the tail tile never reaches the accumulator).
        col = lax.broadcasted_iota(jnp.int32, (B_TILE, C_TILE), 1) + c * C_TILE
        p = jnp.where(col < C, p, 0.0)
    l_sc[...] += jnp.sum(p, axis=1, keepdims=True)

    @pl.when(c == nc - 1)
    def _finalize():
        t = t_ref[...]                                # (B_TILE, 1) = s*cos[i, label_i]
        l_run = l_sc[...]
        e_t = jnp.exp(t - s)
        # margined denominator (shifted by e^{-s}):
        #   sum_{j != t} exp(s*cos_j - s) + exp(s*(cos_t - m) - s)
        #   = (l_run - e_t) + e_t * exp(-s*m)
        # clamp the exclusion at 0 so fp cancellation can never make log()
        # see a negative argument.
        l_margin = jnp.maximum(l_run - e_t, 0.0) + e_t * em
        lse = s + jnp.log(l_margin)
        nll = lse - (t - s_m)                         # (B_TILE, 1)
        if mask_rows:
            row = lax.broadcasted_iota(jnp.int32, (B_TILE, 1), 0) + b * B_TILE
            nll = jnp.where(row < B, nll, 0.0)        # drop padded rows
        # lane-dense (unmasked vst) store of the per-row partials
        out_ref[...] = jnp.broadcast_to(nll, (B_TILE, _LANES))


def cosface_loss(cos, labels, *, s=20.0, m=0.2, loss_weight=1.0,
                 b_tile=256, c_tile=4096):
    """CosFace loss (scalar) computed with a tiled Pallas TPU kernel.

    cos:    (B, C) float32 or bfloat16 cosine similarities
    labels: (B,)   int class indices in [0, C)
    """
    B, C = cos.shape
    itemsize = jnp.dtype(cos.dtype).itemsize
    sub = 16 if itemsize == 2 else 8                  # bf16 packs (16,128)

    # --- batch tile: multiple of the sublane pack; aim for >= 2 b-tiles so
    # the "parallel" batch axis can shard across v7x's two TensorCores.
    b_tile = max(sub, (int(b_tile) // sub) * sub)
    if B <= sub:
        B_TILE = B                                    # single full-dim block
    else:
        half = -(-B // 2)
        half = ((half + sub - 1) // sub) * sub
        B_TILE = min(b_tile, half)
    grid_b = -(-B // B_TILE)

    # --- class tile: multiple of 128, as large as the VMEM budget allows
    # (double-buffered cos tiles are the dominant VMEM consumer).
    c_tile = max(128, (int(c_tile) // 128) * 128)
    max_ct = max(128, (_VMEM_BUDGET // (2 * B_TILE * itemsize)) // 128 * 128)
    c_tile = min(c_tile, max_ct)
    C_TILE = C if C <= c_tile else c_tile
    grid_c = -(-C // C_TILE)

    s = float(s)
    m = float(m)

    # Hoisted target gather: t = s * cos[i, labels[i]].  Tiny (B, 1) input;
    # removes the per-tile iota/compare/select/extra-reduction sweep from the
    # hot loop.  Cast to f32 *before* scaling so bf16 inputs keep precision.
    lbl = labels.reshape(B, 1).astype(jnp.int32)
    t = s * jnp.take_along_axis(cos, lbl, axis=1).astype(jnp.float32)
    pad_b = grid_b * B_TILE - B
    if pad_b:
        t = jnp.pad(t, ((0, pad_b), (0, 0)))

    kernel = functools.partial(
        _cosface_kernel,
        s=s, s_m=s * m, em=math.exp(-s * m),
        B=B, B_TILE=B_TILE, C=C, C_TILE=C_TILE,
        mask_rows=(B % B_TILE != 0), mask_cols=(C % C_TILE != 0))

    out = pl.pallas_call(
        kernel,
        out_shape=jax.ShapeDtypeStruct((grid_b * B_TILE, _LANES), jnp.float32),
        grid_spec=pltpu.PrefetchScalarGridSpec(
            num_scalar_prefetch=0,
            grid=(grid_b, grid_c),                    # class/reduction axis innermost
            in_specs=[
                # tiny per-b-tile target logits; block index constant across c
                pl.BlockSpec((B_TILE, 1), lambda b, c: (b, 0)),
                # main input: (B_TILE, C_TILE) pipelined tiles of cos
                pl.BlockSpec((B_TILE, C_TILE), lambda b, c: (b, c)),
            ],
            # per-b-tile partial NLLs, resident across the c (reduction) axis
            out_specs=pl.BlockSpec((B_TILE, _LANES), lambda b, c: (b, 0)),
            scratch_shapes=[pltpu.VMEM((B_TILE, 1), jnp.float32)],
        ),
        compiler_params=pltpu.CompilerParams(
            dimension_semantics=("parallel", "arbitrary"),
            vmem_limit_bytes=_VMEM_BUDGET,
        ),
    )(t, cos)

    # Tiny final reduction in JAX: padded rows are already zeroed in-kernel.
    return jnp.sum(out[:, 0]) * (float(loss_weight) / B)


def cosface_loss_ref(cos, labels, *, s=20.0, m=0.2, loss_weight=1.0):
    """Pure-JAX reference mirroring the PyTorch forward."""
    B, C = cos.shape
    one_hot = jax.nn.one_hot(labels, C, dtype=cos.dtype)
    output = s * (cos - one_hot * m)
    logp = jax.nn.log_softmax(output, axis=1)
    loss = -jnp.take_along_axis(logp, labels.reshape(-1, 1), axis=1)
    return jnp.mean(loss) * loss_weight


if __name__ == "__main__":
    key = jax.random.PRNGKey(0)
    k1, k2, k3, k4, k5, k6 = jax.random.split(key, 6)

    # Small single-tile case (matches the module's typical toy shapes).
    B, C = 8, 16
    cos = jnp.tanh(jax.random.normal(k1, (B, C), dtype=jnp.float32))
    labels = jax.random.randint(k2, (B,), 0, C, dtype=jnp.int32)
    loss = jax.block_until_ready(cosface_loss(cos, labels, s=20.0, m=0.2,
                                              loss_weight=1.0))
    ref = cosface_loss_ref(cos, labels, s=20.0, m=0.2, loss_weight=1.0)
    assert jnp.allclose(loss, ref, rtol=1e-4, atol=1e-4), (loss, ref)

    # Multi-tile case exercising the streaming exp-sum + row/column tail
    # masking and grid_b >= 2 (small tile overrides keep the data tiny).
    B2, C2 = 20, 300
    cos2 = jnp.tanh(jax.random.normal(k3, (B2, C2), dtype=jnp.float32))
    labels2 = jax.random.randint(k4, (B2,), 0, C2, dtype=jnp.int32)
    loss2 = jax.block_until_ready(
        cosface_loss(cos2, labels2, s=20.0, m=0.2, loss_weight=0.5,
                     b_tile=16, c_tile=128))
    ref2 = cosface_loss_ref(cos2, labels2, s=20.0, m=0.2, loss_weight=0.5)
    assert jnp.allclose(loss2, ref2, rtol=1e-4, atol=1e-4), (loss2, ref2)

    # bf16 input path (halves HBM bytes for the bandwidth-bound sweep);
    # accumulation stays in f32, reference computed on the upcast cosines.
    B3, C3 = 32, 512
    cos3 = jnp.tanh(jax.random.normal(k5, (B3, C3), dtype=jnp.float32)
                    ).astype(jnp.bfloat16)
    labels3 = jax.random.randint(k6, (B3,), 0, C3, dtype=jnp.int32)
    loss3 = jax.block_until_ready(
        cosface_loss(cos3, labels3, s=20.0, m=0.2, loss_weight=1.0,
                     b_tile=16, c_tile=256))
    ref3 = cosface_loss_ref(cos3.astype(jnp.float32), labels3,
                            s=20.0, m=0.2, loss_weight=1.0)
    assert jnp.allclose(loss3, ref3, rtol=1e-3, atol=1e-3), (loss3, ref3)

    print("KERNEL_OK")
</pallas_src>

<mosaic_0001>
module attributes {stable_mosaic.version = 11 : i64} {
  func.func @_cosface_kernel(%arg0: i32, %arg1: i32, %arg2: memref<8x1xf32, #tpu.memory_space<vmem>>, %arg3: memref<8x16xf32, #tpu.memory_space<vmem>>, %arg4: memref<8x128xf32, #tpu.memory_space<vmem>>, %arg5: memref<8x1xf32, #tpu.memory_space<vmem>>) attributes {dimension_semantics = [#tpu.dimension_semantics<parallel>, #tpu.dimension_semantics<arbitrary>], iteration_bounds = array<i64: 1, 1>, scalar_prefetch = 0 : i64, scratch_operands = 1 : i64, tpu.core_type = #tpu.core_type<tc>, window_params = [{transform_indices = @transform_0, window_bounds = array<i64: 8, 1>}, {transform_indices = @transform_1, window_bounds = array<i64: 8, 16>}, {transform_indices = @transform_2, window_bounds = array<i64: 8, 128>}]} {
    %c0_i32 = arith.constant 0 : i32
    %0 = arith.cmpi eq, %arg1, %c0_i32 : i32
    %1 = arith.extui %0 : i1 to i32
    %c0_i32_0 = arith.constant 0 : i32
    %2 = arith.cmpi ne, %1, %c0_i32_0 : i32
    scf.if %2 {
      %cst_10 = arith.constant 0.000000e+00 : f32
      %17 = vector.broadcast %cst_10 : f32 to vector<8x1xf32>
      %c0_11 = arith.constant 0 : index
      %c0_12 = arith.constant 0 : index
      %18 = vector.load %arg5[%c0_11, %c0_12] : memref<8x1xf32, #tpu.memory_space<vmem>>, vector<8x1xf32>
      tpu.vector_store %arg5[%c0_11, %c0_12], %17 {strides = array<i32>} : memref<8x1xf32, #tpu.memory_space<vmem>>, vector<8x1xf32>,
    } else {
    }
    %c0 = arith.constant 0 : index
    %c0_1 = arith.constant 0 : index
    %3 = vector.load %arg3[%c0, %c0_1] : memref<8x16xf32, #tpu.memory_space<vmem>>, vector<8x16xf32>
    %cst = arith.constant 2.000000e+01 : f32
    %4 = vector.broadcast %cst : f32 to vector<8x16xf32>
    %5 = arith.mulf %4, %3 : vector<8x16xf32>
    %cst_2 = arith.constant 2.000000e+01 : f32
    %6 = vector.broadcast %cst_2 : f32 to vector<8x16xf32>
    %7 = arith.subf %5, %6 : vector<8x16xf32>
    %8 = math.exp %7 : vector<8x16xf32>
    %c0_3 = arith.constant 0 : index
    %c0_4 = arith.constant 0 : index
    %9 = vector.load %arg5[%c0_3, %c0_4] : memref<8x1xf32, #tpu.memory_space<vmem>>, vector<8x1xf32>
    %cst_5 = arith.constant dense<0.000000e+00> : vector<8xf32>
    %10 = vector.multi_reduction <add>, %8, %cst_5 [1] : vector<8x16xf32> to vector<8xf32>
    %11 = vector.shape_cast %10 : vector<8xf32> to vector<8x1xf32>
    %12 = arith.addf %9, %11 : vector<8x1xf32>
    %c0_6 = arith.constant 0 : index
    %c0_7 = arith.constant 0 : index
    %13 = vector.load %arg5[%c0_6, %c0_7] : memref<8x1xf32, #tpu.memory_space<vmem>>, vector<8x1xf32>
    tpu.vector_store %arg5[%c0_6, %c0_7], %12 {strides = array<i32>} : memref<8x1xf32, #tpu.memory_space<vmem>>, vector<8x1xf32>,
    %c0_i32_8 = arith.constant 0 : i32
    %14 = arith.cmpi eq, %arg1, %c0_i32_8 : i32
    %15 = arith.extui %14 : i1 to i32
    %c0_i32_9 = arith.constant 0 : i32
    %16 = arith.cmpi ne, %15, %c0_i32_9 : i32
    scf.if %16 {
      %c0_10 = arith.constant 0 : index
      %c0_11 = arith.constant 0 : index
      %17 = vector.load %arg2[%c0_10, %c0_11] : memref<8x1xf32, #tpu.memory_space<vmem>>, vector<8x1xf32>
      %c0_12 = arith.constant 0 : index
      %c0_13 = arith.constant 0 : index
      %18 = vector.load %arg5[%c0_12, %c0_13] : memref<8x1xf32, #tpu.memory_space<vmem>>, vector<8x1xf32>
      %cst_14 = arith.constant 2.000000e+01 : f32
      %19 = vector.broadcast %cst_14 : f32 to vector<8x1xf32>
      %20 = arith.subf %17, %19 : vector<8x1xf32>
      %21 = math.exp %20 : vector<8x1xf32>
      %22 = arith.subf %18, %21 : vector<8x1xf32>
      %cst_15 = arith.constant 0.000000e+00 : f32
      %23 = vector.broadcast %cst_15 : f32 to vector<8x1xf32>
      %24 = arith.maximumf %22, %23 : vector<8x1xf32>
      %cst_16 = arith.constant 0.0183156393 : f32
      %25 = vector.broadcast %cst_16 : f32 to vector<8x1xf32>
      %26 = arith.mulf %21, %25 : vector<8x1xf32>
      %27 = arith.addf %24, %26 : vector<8x1xf32>
      %28 = math.log %27 : vector<8x1xf32>
      %cst_17 = arith.constant 2.000000e+01 : f32
      %29 = vector.broadcast %cst_17 : f32 to vector<8x1xf32>
      %30 = arith.addf %29, %28 : vector<8x1xf32>
      %cst_18 = arith.constant 4.000000e+00 : f32
      %31 = vector.broadcast %cst_18 : f32 to vector<8x1xf32>
      %32 = arith.subf %17, %31 : vector<8x1xf32>
      %33 = arith.subf %30, %32 : vector<8x1xf32>
      %34 = vector.shape_cast %33 : vector<8x1xf32> to vector<8x1xf32>
      %35 = vector.broadcast %34 : vector<8x1xf32> to vector<8x128xf32>
      %c0_19 = arith.constant 0 : index
      %c0_20 = arith.constant 0 : index
      %36 = vector.load %arg4[%c0_19, %c0_20] : memref<8x128xf32, #tpu.memory_space<vmem>>, vector<8x128xf32>
      tpu.vector_store %arg4[%c0_19, %c0_20], %35 {strides = array<i32>} : memref<8x128xf32, #tpu.memory_space<vmem>>, vector<8x128xf32>,
    } else {
    }
    return
  }
  func.func @transform_0(%arg0: i32, %arg1: i32) -> (i32, i32) {
    %c0_i32 = arith.constant 0 : i32
    %c0_i32_0 = arith.constant 0 : i32
    return %arg0, %c0_i32 : i32, i32
  }
  func.func @transform_1(%arg0: i32, %arg1: i32) -> (i32, i32) {
    %c0_i32 = arith.constant 0 : i32
    return %arg0, %arg1 : i32, i32
  }
  func.func @transform_2(%arg0: i32, %arg1: i32) -> (i32, i32) {
    %c0_i32 = arith.constant 0 : i32
    %c0_i32_0 = arith.constant 0 : i32
    return %arg0, %c0_i32 : i32, i32
  }
}

</mosaic_0001>

<bundles_post_ra>
// kernel: tpu_custom_call.1
= control target key start
LH: loop header
LB: loop body
LE: loop exit
PB: predicated region body
PF: predicated region fallthrough
CT: control target
= control target key end

     0   :  { %s130_s0 = inlined_call_operand.vmem [shape: f32[8,1], index: 0, kind: input, shape index: {}]   ;;  %s131_s1 = inlined_call_operand.vmem [shape: f32[8,16], index: 1, kind: input, shape index: {}]   ;;  %s132_s2 = inlined_call_operand.hbm [shape: f32[8,128], index: 2, kind: output, shape index: {}]  }
   0x1   :  { %v18_v0 = vld [vmem:[%s131_s1] sm:$0xff] }
   0x2   :  { %7 = vsyncpa [#allocation4], 0  ;;  %v19_v1 = vmul.f32 20.0, %v18_v0  ;;  %vm24_vm0 = vcmask 130048   ;;  %vm16_vm1 = vcmask 7168   ;;  %v103_v6 = vmov 0.0  }
   0x3   :  { %17 = vst.msk [vmem:[#allocation2] sm:$0xff] %vm16_vm1, %v103_v6  ;;  %v104_v7 = vmov 0   ;;  %v34_v8 = vld [vmem:[%s130_s0] sm:$0xff]  ;;  %s105_s0 = smov [#allocation3]  }
   0x4   :  { %v68_v2 = vadd.f32 -20.0, %v19_v1  ;;  %74 = vset.pattern.permute.xlu0 %v104_v7  ;;  %v69_v9 = vadd.f32 -20.0, %v34_v8  ;;  %v70_v22 = vadd.f32 -4.0, %v34_v8  ;;  %s60_s1 = sshll.u32 %s105_s0, 4  ;;  %s61_s1 = int_to_ptr.vmem [resolvable:$true] %s60_s1 }
   0x5   :  { %s81_s13 = scalar_lea.vmem %s61_s1, 128  ;;  %p86_p1 = scmp.lt.s32.totalorder %s61_s1, %s61_s1 }
   0x6   :  { %v21_v3 = vmul.f32 1.442695, %v68_v2  ;;  %v37_v10 = vmul.f32 1.442695, %v69_v9  ;;  %p82_p0 = scmp.ne.s32.totalorder %s61_s1, %s81_s13  ;;  %p87_p2 = scmp.lt.s32.totalorder %s81_s13, %s81_s13 }
   0x8   :  { %75 = vpow2.f32 %v21_v3  ;;  %p88_p3 = por %p87_p2, %p86_p1 }
   0x9   :  { %77 = vpow2.f32 %v37_v10 }
   0xa   :  { %v23_v11 = vld [vmem:[#allocation2] sm:$0xff]  ;;  %p89_p4 = pnand %p88_p3, %p82_p0 }
  0x15   :  { %v76_v4 = vpop.eup %75 }
  0x16   :  { %v25_v5 = vsel %vm24_vm0, %v76_v4, 0.0  ;;  %v78_v14 = vpop.eup %77 }
  0x17   :  { %26 = vadd.xlane.f32.xlu0 %v25_v5  ;;  %v41_v17 = vmul.f32 0.01831564, %v78_v14 }
  0xa0   :  { %v27_v12 = vpop.xlane.xlu0 %26 }
  0xa1   :  { %v28_v13 = vadd.f32 %v27_v12, %v23_v11 }
  0xa3   :  { %30 = vst.msk [vmem:[#allocation2] sm:$0xff] %vm16_vm1, %v28_v13 }
  0xaa   :  { %v35_v15 = vld [vmem:[#allocation2] sm:$0xff] }
  0xab   :  { %v39_v16 = vsub.f32 %v35_v15, %v78_v14 }
  0xad   :  { %v40_v18 = vmax.f32 %v39_v16, 0.0 }
  0xaf   :  { %v42_v19 = vadd.f32 %v41_v17, %v40_v18 }
  0xb1   :  { %79 = vlog2.f32 %v42_v19 }
  0xbe   :  { %v80_v20 = vpop.eup %79 }
  0xbf   :  { %v44_v21 = vmul.f32 0.6931472, %v80_v20 }
  0xc1   :  { %v45_v23 = vadd.f32 20.0, %v44_v21 }
  0xc3   :  { %v47_v24 = vsub.f32 %v45_v23, %v70_v22 }
  0xc5   :  { %50 = vperm.xlu0 %74, %v47_v24  }
 0x140   :  { %v51_v25 = vpop.permute.xlu0 %50 }
 0x141   :  { %53 = vst [vmem:[#allocation3] sm:$0xff] %v51_v25 }
 0x142   :  { %92 = shalt.err (!%p89_p4)
}
 0x143   :  { %63 = dma.vmem_to_hbm [thread:$0]  %s61_s1, 128, %s132_s2, [#allocation4]  }
 0x144   :  { %101 = dma.done.wait [#allocation4], 128  }
 0x145   :  { %102 = vsyncadd [#allocation4], 4294967168 }
 0x146   :  { %67 = vsyncpa [#allocation4], 1 }

</bundles_post_ra>
